<compile_context>
chip_gen: v7x
topology: tpu7x:2x2x1
jax: 0.10.0
libtpu: 0.0.40
codegen_flags: <defaults>
</compile_context>

<pallas_src>
import jax
import jax.numpy as jnp
from jax.experimental import pallas as pl
from jax.experimental.pallas import tpu as pltpu

_LANE = 128
_VMEM_BUDGET = 32 * 1024 * 1024       # conservative per-step budget (v7x-safe)
_W_RESIDENT_BUDGET = 16 * 1024 * 1024  # above this, tile E_out instead of keeping W resident


def _round_up(x, m):
    return ((x + m - 1) // m) * m


def _vmem_tile_bytes(rows, cols, itemsize):
    # rough (8,128)-tile-padded VMEM footprint of one 2-D buffer
    return _round_up(rows, 8) * _round_up(cols, _LANE) * itemsize


def _vmem_limit(estimate):
    # generous headroom over the per-step estimate, capped below v7x physical VMEM
    return int(min(max(2 * estimate, estimate + (8 << 20), 16 << 20), 60 << 20))


def bp_vc_kernel(inp_ref, llr_ref, w1_ref, w2_ref, out_ref):
    """out = inp @ W1 + llr @ W2  (bf16 operands, f32 MXU accumulation).

    mask, llr_weight, the transposes and the 0.5 scale are all folded into the
    static W1/W2 outside the kernel, so the body is two MXU pushes and a store.
    """
    acc = jnp.dot(inp_ref[...], w1_ref[...], preferred_element_type=jnp.float32)
    acc += jnp.dot(llr_ref[...], w2_ref[...], preferred_element_type=jnp.float32)
    out_ref[...] = acc.astype(out_ref.dtype)


def fold_static_weights(input_weight, mask, llr_weight, llr_expander):
    """One-time static precompute (run once per decoder, NOT per forward call)."""
    e_out = mask.shape[0]
    e_out_pad = _round_up(e_out, _LANE)
    w1 = 0.5 * (mask * input_weight).T              # [E_in, E_out]
    w2 = 0.5 * (llr_expander * llr_weight).T        # [V,    E_out]  (llr_weight folded)
    pad = e_out_pad - e_out
    if pad:
        w1 = jnp.pad(w1, ((0, 0), (0, pad)))
        w2 = jnp.pad(w2, ((0, 0), (0, pad)))
    return w1.astype(jnp.bfloat16), w2.astype(jnp.bfloat16), e_out


def belief_propagation_vc(inp, llr, w1, w2, e_out, *, block_b=512, block_n=None,
                          out_dtype=jnp.float32):
    """Forward pass.  inp: [B, E_in], llr: [B, V]; w1/w2 from fold_static_weights."""
    # TODO(synk): if the producing layer already emits bf16 activations, drop these casts
    #             (and emit bf16 output via out_dtype=jnp.bfloat16 to halve writeback).
    inp = inp.astype(jnp.bfloat16)
    llr = llr.astype(jnp.bfloat16)
    b, e_in = inp.shape
    v = llr.shape[1]
    e_out_pad = w1.shape[1]
    out_isz = jnp.dtype(out_dtype).itemsize

    w_bytes = _vmem_tile_bytes(e_in, e_out_pad, 2) + _vmem_tile_bytes(v, e_out_pad, 2)

    # ---------- small-batch path: one grid-less call, everything VMEM-resident ----------
    # (For throughput, callers should batch codewords so B >= 128 before relying on this.)
    small_bytes = (w_bytes
                   + _vmem_tile_bytes(b, e_in, 2)
                   + _vmem_tile_bytes(b, v, 2)
                   + _vmem_tile_bytes(b, e_out_pad, out_isz))
    if b <= 128 and small_bytes <= _VMEM_BUDGET:
        vmem = pl.BlockSpec(memory_space=pltpu.MemorySpace.VMEM)
        out = pl.pallas_call(
            bp_vc_kernel,
            out_shape=jax.ShapeDtypeStruct((b, e_out_pad), out_dtype),
            in_specs=[vmem, vmem, vmem, vmem],
            out_specs=vmem,
            compiler_params=pltpu.CompilerParams(
                vmem_limit_bytes=_vmem_limit(small_bytes)),
        )(inp, llr, w1, w2)
        return out[:, :e_out] if e_out_pad != e_out else out

    # ---------- batch-tiled paths ----------
    block_b = max(128, min(block_b, _round_up(b, 128)))
    if block_n is None and w_bytes > _W_RESIDENT_BUDGET:
        block_n = 512                      # bound the resident W tile (v7x: 64 MiB VMEM)
    if block_n is not None:
        block_n = min(_round_up(block_n, _LANE), e_out_pad)

    if block_n is None or block_n >= e_out_pad:
        # -- Variant A: weights fully VMEM-resident (DMA'd once, no double-buffering) --
        def step_bytes(bb):
            return (2 * _vmem_tile_bytes(bb, e_in, 2)          # inp tile, double-buffered
                    + 2 * _vmem_tile_bytes(bb, v, 2)           # llr tile
                    + 2 * _vmem_tile_bytes(bb, e_out_pad, out_isz)  # out tile
                    + w_bytes)                                 # W resident once
        while block_b > 128 and step_bytes(block_b) > _VMEM_BUDGET:
            block_b //= 2
        nb = pl.cdiv(b, block_b)
        w_spec = pl.BlockSpec(memory_space=pltpu.MemorySpace.VMEM)
        out = pl.pallas_call(
            bp_vc_kernel,
            out_shape=jax.ShapeDtypeStruct((b, e_out_pad), out_dtype),
            grid=(nb,),
            in_specs=[pl.BlockSpec((block_b, e_in), lambda i: (i, 0)),
                      pl.BlockSpec((block_b, v), lambda i: (i, 0)),
                      w_spec, w_spec],
            out_specs=pl.BlockSpec((block_b, e_out_pad), lambda i: (i, 0)),
            compiler_params=pltpu.CompilerParams(
                dimension_semantics=("parallel",),
                vmem_limit_bytes=_vmem_limit(step_bytes(block_b))),
        )(inp, llr, w1, w2)
    else:
        # -- Variant B: 2-D grid tiling both B and E_out (large codes / v7x) --
        def step_bytes(bb, bn):
            return (2 * _vmem_tile_bytes(bb, e_in, 2)
                    + 2 * _vmem_tile_bytes(bb, v, 2)
                    + 2 * _vmem_tile_bytes(bb, bn, out_isz)
                    + 2 * _vmem_tile_bytes(e_in, bn, 2)
                    + 2 * _vmem_tile_bytes(v, bn, 2))
        while block_b > 128 and step_bytes(block_b, block_n) > _VMEM_BUDGET:
            block_b //= 2
        nb = pl.cdiv(b, block_b)
        nn = pl.cdiv(e_out_pad, block_n)
        out = pl.pallas_call(
            bp_vc_kernel,
            out_shape=jax.ShapeDtypeStruct((b, e_out_pad), out_dtype),
            grid=(nb, nn),
            in_specs=[pl.BlockSpec((block_b, e_in), lambda i, j: (i, 0)),
                      pl.BlockSpec((block_b, v), lambda i, j: (i, 0)),
                      pl.BlockSpec((e_in, block_n), lambda i, j: (0, j)),
                      pl.BlockSpec((v, block_n), lambda i, j: (0, j))],
            out_specs=pl.BlockSpec((block_b, block_n), lambda i, j: (i, j)),
            compiler_params=pltpu.CompilerParams(
                dimension_semantics=("parallel", "parallel"),
                vmem_limit_bytes=_vmem_limit(step_bytes(block_b, block_n))),
        )(inp, llr, w1, w2)

    # TODO(synk): skip this slice if the downstream CV layer can consume the
    #             128-padded E_out layout (saves one HBM pass over the output).
    return out[:, :e_out] if e_out_pad != e_out else out


if __name__ == "__main__":
    B, E_IN, E_OUT, V = 8, 32, 32, 16
    key = jax.random.PRNGKey(0)
    k_mask, k_exp, k_inp, k_llr = jax.random.split(key, 4)

    # Deterministic 0/1 connectivity matrices (Tanner-graph masks).
    mask = jax.random.bernoulli(k_mask, 0.3, (E_OUT, E_IN)).astype(jnp.float32)
    llr_expander = jax.random.bernoulli(k_exp, 0.3, (E_OUT, V)).astype(jnp.float32)
    input_weight = jnp.ones((E_OUT, E_IN), jnp.float32) * mask   # as in __init__
    llr_weight = jnp.ones((1, V), jnp.float32)

    w1, w2, e_out = fold_static_weights(input_weight, mask, llr_weight, llr_expander)

    def reference_f32(inp, llr):
        return 0.5 * (inp @ (mask * input_weight).T + (llr_weight * llr) @ llr_expander.T)

    def reference_bf16(inp, llr):
        # same bf16 operand rounding as the kernel, f32 math
        return (inp.astype(jnp.bfloat16).astype(jnp.float32) @ w1.astype(jnp.float32)[:, :e_out]
                + llr.astype(jnp.bfloat16).astype(jnp.float32) @ w2.astype(jnp.float32)[:, :e_out])

    # --- test 1: small-batch (grid-less, fully VMEM-resident) path ---
    inp = jax.random.normal(k_inp, (B, E_IN), jnp.float32)
    llr = jax.random.normal(k_llr, (B, V), jnp.float32)
    out = jax.block_until_ready(belief_propagation_vc(inp, llr, w1, w2, e_out))
    assert out.shape == (B, E_OUT)
    assert jnp.allclose(out, reference_bf16(inp, llr), atol=1e-4, rtol=1e-4)
    assert jnp.allclose(out, reference_f32(inp, llr), atol=5e-2, rtol=5e-2)

    # --- test 2: batch-tiled path, weights VMEM-resident, ragged grid (B=200) ---
    B2 = 200
    k2a, k2b = jax.random.split(jax.random.PRNGKey(1))
    inp2 = jax.random.normal(k2a, (B2, E_IN), jnp.float32)
    llr2 = jax.random.normal(k2b, (B2, V), jnp.float32)
    out2 = jax.block_until_ready(
        belief_propagation_vc(inp2, llr2, w1, w2, e_out, block_b=128))
    assert out2.shape == (B2, E_OUT)
    assert jnp.allclose(out2, reference_bf16(inp2, llr2), atol=1e-4, rtol=1e-4)
    assert jnp.allclose(out2, reference_f32(inp2, llr2), atol=5e-2, rtol=5e-2)

    # --- test 3: 2-D grid path tiling E_out as well (large-code / v7x regime) ---
    E_OUT3, B3 = 256, 256
    k3 = jax.random.split(jax.random.PRNGKey(2), 4)
    mask3 = jax.random.bernoulli(k3[0], 0.3, (E_OUT3, E_IN)).astype(jnp.float32)
    exp3 = jax.random.bernoulli(k3[1], 0.3, (E_OUT3, V)).astype(jnp.float32)
    iw3 = jnp.ones((E_OUT3, E_IN), jnp.float32) * mask3
    lw3 = jnp.ones((1, V), jnp.float32)
    w1_3, w2_3, e_out3 = fold_static_weights(iw3, mask3, lw3, exp3)
    inp3 = jax.random.normal(k3[2], (B3, E_IN), jnp.float32)
    llr3 = jax.random.normal(k3[3], (B3, V), jnp.float32)
    out3 = jax.block_until_ready(
        belief_propagation_vc(inp3, llr3, w1_3, w2_3, e_out3, block_b=128, block_n=128))
    ref3 = (inp3.astype(jnp.bfloat16).astype(jnp.float32) @ w1_3.astype(jnp.float32)
            + llr3.astype(jnp.bfloat16).astype(jnp.float32) @ w2_3.astype(jnp.float32))
    ref3_f32 = 0.5 * (inp3 @ (mask3 * iw3).T + (lw3 * llr3) @ exp3.T)
    assert out3.shape == (B3, E_OUT3)
    assert jnp.allclose(out3, ref3, atol=1e-4, rtol=1e-4)
    assert jnp.allclose(out3, ref3_f32, atol=5e-2, rtol=5e-2)

    print("KERNEL_OK")
</pallas_src>

<mosaic_0001>
module attributes {stable_mosaic.version = 11 : i64} {
  func.func @bp_vc_kernel(%arg0: memref<8x32xbf16, #tpu.memory_space<vmem>>, %arg1: memref<8x16xbf16, #tpu.memory_space<vmem>>, %arg2: memref<32x128xbf16, #tpu.memory_space<vmem>>, %arg3: memref<16x128xbf16, #tpu.memory_space<vmem>>, %arg4: memref<8x128xf32, #tpu.memory_space<vmem>>) attributes {dimension_semantics = [], scalar_prefetch = 0 : i64, scratch_operands = 0 : i64, tpu.core_type = #tpu.core_type<tc>} {
    %c0 = arith.constant 0 : index
    %c0_0 = arith.constant 0 : index
    %0 = vector.load %arg0[%c0, %c0_0] : memref<8x32xbf16, #tpu.memory_space<vmem>>, vector<8x32xbf16>
    %c0_1 = arith.constant 0 : index
    %c0_2 = arith.constant 0 : index
    %1 = vector.load %arg2[%c0_1, %c0_2] : memref<32x128xbf16, #tpu.memory_space<vmem>>, vector<32x128xbf16>
    %cst = arith.constant dense<0.000000e+00> : vector<8x128xf32>
    %2 = tpu.matmul %0, %1, %cst {dimension_numbers = #tpu.dot_dimension_numbers<[1], [0], [0], [1], [0, 0, 1, 1], [], []>} : vector<8x32xbf16>, vector<32x128xbf16>, vector<8x128xf32> -> vector<8x128xf32>
    %c0_3 = arith.constant 0 : index
    %c0_4 = arith.constant 0 : index
    %3 = vector.load %arg1[%c0_3, %c0_4] : memref<8x16xbf16, #tpu.memory_space<vmem>>, vector<8x16xbf16>
    %c0_5 = arith.constant 0 : index
    %c0_6 = arith.constant 0 : index
    %4 = vector.load %arg3[%c0_5, %c0_6] : memref<16x128xbf16, #tpu.memory_space<vmem>>, vector<16x128xbf16>
    %cst_7 = arith.constant dense<0.000000e+00> : vector<8x128xf32>
    %5 = tpu.matmul %3, %4, %cst_7 {dimension_numbers = #tpu.dot_dimension_numbers<[1], [0], [0], [1], [0, 0, 1, 1], [], []>} : vector<8x16xbf16>, vector<16x128xbf16>, vector<8x128xf32> -> vector<8x128xf32>
    %6 = arith.addf %2, %5 : vector<8x128xf32>
    %c0_8 = arith.constant 0 : index
    %c0_9 = arith.constant 0 : index
    %7 = vector.load %arg4[%c0_8, %c0_9] : memref<8x128xf32, #tpu.memory_space<vmem>>, vector<8x128xf32>
    tpu.vector_store %arg4[%c0_8, %c0_9], %6 {strides = array<i32>} : memref<8x128xf32, #tpu.memory_space<vmem>>, vector<8x128xf32>,
    return
  }
}

</mosaic_0001>

<bundles_post_ra>
// kernel: tpu_custom_call.1
= control target key start
LH: loop header
LB: loop body
LE: loop exit
PB: predicated region body
PF: predicated region fallthrough
CT: control target
= control target key end

     0   :  { %9 = vsyncpa [#allocation3], 0  ;;  %s401_s0 = inlined_call_operand.hbm [shape: bf16[8,32], index: 0, kind: input, shape index: {}]   ;;  %s402_s1 = inlined_call_operand.hbm [shape: bf16[8,16], index: 1, kind: input, shape index: {}]   ;;  %s403_s2 = inlined_call_operand.hbm [shape: bf16[32,128], index: 2, kind: input, shape index: {}]   ;;  %s404_s3 = inlined_call_operand.vmem [shape: bf16[16,128], index: 3, kind: input, shape index: {}]   ;;  %s405_s4 = inlined_call_operand.hbm [shape: f32[8,128], index: 4, kind: output, shape index: {}]  }
   0x1   :  { %10 = vsyncpa [#allocation6], 0 }
   0x2   :  { %11 = vsyncpa [#allocation4], 0  ;;  %s317_s15 = smov [#allocation5]   ;;  %s318_s17 = smov [#allocation2]  }
   0x3   :  { %s28_s16 = sshll.u32 %s317_s15, 4  ;;  %s18_s18 = sshll.u32 %s318_s17, 4  ;;  %s29_s16 = int_to_ptr.vmem [resolvable:$true] %s28_s16  ;;  %s19_s18 = int_to_ptr.vmem [resolvable:$true] %s18_s18 }
   0x4   :  { %s223_s21 = scalar_lea.hbm %s402_s1, 64 }
   0x5   :  { %p224_p0 = scmp.ne.s32.totalorder %s402_s1, %s223_s21  ;;  %p227_p1 = scmp.lt.u32.totalorder %s223_s21, %s402_s1 }
   0x7   :  { %p229_p2 = pnand %p227_p1, %p224_p0 }
   0x9   :  { %232 = shalt.err (!%p229_p2)
}
   0xa   :  { %s233_s26 = scalar_lea.vmem %s29_s16, 64  ;;  %p238_p4 = scmp.lt.s32.totalorder %s29_s16, %s29_s16 }
   0xb   :  { %p234_p3 = scmp.ne.s32.totalorder %s29_s16, %s233_s26  ;;  %p239_p5 = scmp.lt.s32.totalorder %s233_s26, %s233_s26 }
   0xd   :  { %p240_p6 = por %p239_p5, %p238_p4 }
   0xf   :  { %p241_p7 = pnand %p240_p6, %p234_p3 }
  0x11   :  { %244 = shalt.err (!%p241_p7)
}
  0x12   :  { %31 = dma.hbm_to_vmem [thread:$0]  %s402_s1, 64, %s29_s16, [#allocation6]  }
  0x13   :  { %s245_s5 = scalar_lea.hbm %s401_s0, 64 }
  0x14   :  { %p246_p8 = scmp.ne.s32.totalorder %s401_s0, %s245_s5  ;;  %p249_p9 = scmp.lt.u32.totalorder %s245_s5, %s401_s0 }
  0x16   :  { %p251_p10 = pnand %p249_p9, %p246_p8 }
  0x18   :  { %254 = shalt.err (!%p251_p10)
}
  0x19   :  { %s255_s10 = scalar_lea.vmem %s19_s18, 64  ;;  %p260_p12 = scmp.lt.s32.totalorder %s19_s18, %s19_s18 }
  0x1a   :  { %p256_p11 = scmp.ne.s32.totalorder %s19_s18, %s255_s10  ;;  %p261_p13 = scmp.lt.s32.totalorder %s255_s10, %s255_s10 }
  0x1c   :  { %p262_p0 = por %p261_p13, %p260_p12 }
  0x1e   :  { %p263_p1 = pnand %p262_p0, %p256_p11 }
  0x20   :  { %266 = shalt.err (!%p263_p1)
}
  0x21   :  { %21 = dma.hbm_to_vmem [thread:$0]  %s401_s0, 64, %s19_s18, [#allocation3]  }
  0x22   :  { %s319_s12 = smov [#allocation7]   ;;  %s267_s16 = scalar_lea.hbm %s403_s2, 256 }
  0x23   :  { %s37_s13 = sshll.u32 %s319_s12, 4  ;;  %p268_p2 = scmp.ne.s32.totalorder %s403_s2, %s267_s16  ;;  %s38_s13 = int_to_ptr.vmem [resolvable:$true] %s37_s13 }
  0x24   :  { %p271_p3 = scmp.lt.u32.totalorder %s267_s16, %s403_s2 }
  0x26   :  { %p273_p4 = pnand %p271_p3, %p268_p2 }
  0x28   :  { %276 = shalt.err (!%p273_p4)
}
  0x29   :  { %s277_s22 = scalar_lea.vmem %s38_s13, 256  ;;  %p282_p6 = scmp.lt.s32.totalorder %s38_s13, %s38_s13 }
  0x2a   :  { %p278_p5 = scmp.ne.s32.totalorder %s38_s13, %s277_s22  ;;  %p283_p7 = scmp.lt.s32.totalorder %s277_s22, %s277_s22 }
  0x2c   :  { %p284_p8 = por %p283_p7, %p282_p6 }
  0x2e   :  { %p285_p9 = pnand %p284_p8, %p278_p5 }
  0x30   :  { %288 = shalt.err (!%p285_p9)
}
  0x31   :  { %s320_s0 = smov 64   ;;  %s321_s18 = smov 4  }
  0x32   :  { %43 = dma.hbm_to_vmem [thread:$0]  %s403_s2, 256, %s38_s13, [#allocation6], %s320_s0, %s320_s0, %s321_s18  }
  0x33   :  { %311 = dma.done.wait [#allocation3], 64  }
  0x34   :  { %312 = vsyncadd [#allocation3], 4294967232 }
  0x35   :  { %313 = dma.done.wait [#allocation6], 320  }
  0x36   :  { %314 = vsyncadd [#allocation6], 4294966976  ;;  %v322_v0 = vmov 0.0   ;;  %vm323_vm0 = vmmov 0   ;;  %v220_v1 = vld [vmem:[#allocation7] sm:$0xff]   ;;  %v221_v2 = vld [vmem:[%s404_s3] sm:$0xff]  }
  0x37   :  { %203 = vmatprep.subr.bf16.mxu0 %v322_v0  ;;  %197 = vmatprep.subr.bf16.mxu1 %v322_v0  ;;  %v61_v3 = vld [vmem:[#allocation5] sm:$0xf]  ;;  %vm70_vm1 = vcmask 130048   ;;  %v222_v4 = vld [vmem:[#allocation7 + $0x8] sm:$0xff]   ;;  %v56_v5 = vld [vmem:[#allocation2] sm:$0xf] }
  0x38   :  { %199 = vmatprep.mubr.msk.bf16.mxu1 %vm323_vm0, %v322_v0  ;;  %207 = vmatprep.mubr.msk.bf16.mxu0 %vm323_vm0, %v322_v0  ;;  %vm126_vm2 = vcmask 261120   ;;  %s324_s2 = smov [#allocation8]  }
  0x39   :  { %204 = vmatpush3.bf16.msra.mxu0 %v220_v1  ;;  %198 = vmatpush3.bf16.msra.mxu1 %v221_v2  ;;  %s177_s27 = sshll.u32 %s324_s2, 4  ;;  %s178_s27 = int_to_ptr.vmem [resolvable:$true] %s177_s27 }
  0x3a   :  { %205 = vmatprep.subr.bf16.mxu0 %v322_v0  ;;  %s289_s3 = scalar_lea.vmem %s178_s27, 128  ;;  %p294_p11 = scmp.lt.s32.totalorder %s178_s27, %s178_s27 }
  0x3b   :  { %p290_p10 = scmp.ne.s32.totalorder %s178_s27, %s289_s3  ;;  %p295_p12 = scmp.lt.s32.totalorder %s289_s3, %s289_s3 }
  0x3c   :  { %200 = vmatmul.mubr.msk.bf16.vlgmr.msra.gmra.mrb[0].mxu1 %vm70_vm1, %v61_v3 }
  0x3d   :  { %206 = vmatpush3.bf16.msra.mxu0 %v222_v4  ;;  %p296_p13 = por %p295_p12, %p294_p11 }
  0x3f   :  { %p297_p0 = pnand %p296_p13, %p290_p10 }
  0x40   :  { %208 = vmatmul.mubr.msk.bf16.vlgmr.msra.gmra.mrb[0].mxu0 %vm126_vm2, %v56_v5 }
 0x10f   :  { %v108_v6 = vpop.f32.mrb[0].mxu1 }
 0x110   :  { %v201_v7 = vpop.f32.mrb[1].mxu1 }
 0x111   :  { %v111_v8 = vpop.f32.mrb[2].mxu1 }
 0x112   :  { %v202_v9 = vpop.f32.mrb[3].mxu1 }
 0x113   :  { %v164_v10 = vpop.f32.mrb[0].mxu0 }
 0x114   :  { %v165_v11 = vadd.f32 %v164_v10, %v108_v6  ;;  %v209_v12 = vpop.f32.mrb[1].mxu0 }
 0x115   :  { %v167_v13 = vpop.f32.mrb[2].mxu0 }
 0x116   :  { %170 = vst [vmem:[#allocation8] sm:$0xff] %v165_v11  ;;  %v210_v14 = vpop.f32.mrb[3].mxu0 }
 0x117   :  { %300 = shalt.err (!%p297_p0)
}
 0x118   :  { %s301_s30 = scalar_lea.hbm %s405_s4, 128 }
 0x119   :  { %p302_p1 = scmp.ne.s32.totalorder %s405_s4, %s301_s30  ;;  %p305_p2 = scmp.lt.u32.totalorder %s301_s30, %s405_s4 }
 0x11b   :  { %p307_p3 = pnand %p305_p2, %p302_p1 }
 0x11d   :  { %310 = shalt.err (!%p307_p3)
}
 0x11e   :  { %180 = dma.vmem_to_hbm [thread:$0]  %s178_s27, 128, %s405_s4, [#allocation4]  }
 0x11f   :  { %315 = dma.done.wait [#allocation4], 128  }
 0x120   :  { %316 = vsyncadd [#allocation4], 4294967168 }
 0x121   :  { %184 = vsyncpa [#allocation3], 1 }
 0x122   :  { %185 = vsyncpa [#allocation6], 1 }
 0x123   :  { %186 = vsyncpa [#allocation4], 1 }

</bundles_post_ra>
